<compile_context>
chip_gen: v7x
topology: tpu7x:2x2x1
jax: 0.10.0
libtpu: 0.0.40
codegen_flags: <defaults>
</compile_context>

<pallas_src>
import jax
import jax.numpy as jnp
from jax.experimental import pallas as pl
from jax.experimental.pallas import tpu as pltpu

LN_EPS = 1e-5
HIDDEN = 512
PAD_IN = 8      # pad the K=5 contraction to a sublane-aligned 8
PAD_OUT = 128   # pad the 6-wide output to one full lane width (no masked stores)


def _round_up(x, m):
    return (x + m - 1) // m * m


def qnet_kernel(x_ref, w1_ref, b1_ref, g_ref, be_ref,
                w2_ref, b2_ref, w3_ref, b3_ref, o_ref):
    """One (TILE_B, :) batch tile of the fused QNetwork forward."""
    mxu_dtype = w1_ref.dtype  # bf16 (or f32) for the MXU operands

    # ---- Layer 1: Linear(PAD_IN, 512), f32 accumulation ----
    x = x_ref[...].astype(mxu_dtype)
    h = jnp.dot(x, w1_ref[...], preferred_element_type=jnp.float32) + b1_ref[...]

    # ---- LayerNorm(512): single-pass stats (one XLU reduction chain), f32 ----
    inv_n = 1.0 / h.shape[-1]
    s = jnp.sum(h, axis=-1, keepdims=True)
    ss = jnp.sum(h * h, axis=-1, keepdims=True)
    mu = s * inv_n
    var = jnp.maximum(ss * inv_n - mu * mu, 0.0)        # biased variance (PyTorch)
    hn = (h - mu) * jax.lax.rsqrt(var + LN_EPS)
    hn = hn * g_ref[...] + be_ref[...]

    # ---- ReLU ----
    hn = jnp.maximum(hn, 0.0)

    # ---- Layer 2: Linear(512, 512) + ReLU ----
    h2 = jnp.dot(hn.astype(mxu_dtype), w2_ref[...],
                 preferred_element_type=jnp.float32) + b2_ref[...]
    h2 = jnp.maximum(h2, 0.0)

    # ---- Layer 3: Linear(512, PAD_OUT) -- lane-dense 128-wide output slab ----
    o_ref[...] = jnp.dot(h2.astype(mxu_dtype), w3_ref[...],
                         preferred_element_type=jnp.float32) + b3_ref[...]


def qnetwork_forward(x, params, *, tile_b=256, param_dtype=jnp.bfloat16):
    """x: (B, input_dim) float32 -> (B, output_dim) float32."""
    w1, b1, gamma, beta, w2, b2, w3, b3 = params
    B, input_dim = x.shape
    hidden = w1.shape[1]
    out_dim = w3.shape[1]

    # Batch tile: MXU-friendly (multiple of 8; 256+ for real batches).
    tile_b = min(tile_b, _round_up(B, 8))
    b_pad = _round_up(B, tile_b)
    grid = (b_pad // tile_b,)

    # Host-side padding / packing (all cheap relative to the kernel):
    xp = jnp.zeros((b_pad, PAD_IN), jnp.float32).at[:B, :input_dim].set(x)
    w1p = jnp.zeros((PAD_IN, hidden), param_dtype).at[:input_dim, :].set(
        w1.astype(param_dtype))
    w2p = w2.astype(param_dtype)
    w3p = jnp.zeros((hidden, PAD_OUT), param_dtype).at[:, :out_dim].set(
        w3.astype(param_dtype))
    b3p = jnp.zeros((1, PAD_OUT), jnp.float32).at[:, :out_dim].set(b3)

    batch_tiled = lambda shp: pl.BlockSpec(shp, lambda i: (i, 0))
    resident = lambda shp: pl.BlockSpec(shp, lambda i: (0, 0))   # VMEM-resident

    out = pl.pallas_call(
        qnet_kernel,
        out_shape=jax.ShapeDtypeStruct((b_pad, PAD_OUT), jnp.float32),
        grid_spec=pltpu.PrefetchScalarGridSpec(
            num_scalar_prefetch=0,
            grid=grid,
            in_specs=[
                batch_tiled((tile_b, PAD_IN)),     # x tile
                resident((PAD_IN, hidden)),        # w1 (bf16)
                resident((1, hidden)),             # b1
                resident((1, hidden)),             # gamma
                resident((1, hidden)),             # beta
                resident((hidden, hidden)),        # w2 (bf16)
                resident((1, hidden)),             # b2
                resident((hidden, PAD_OUT)),       # w3 (bf16, lane-padded)
                resident((1, PAD_OUT)),            # b3 (lane-padded)
            ],
            out_specs=batch_tiled((tile_b, PAD_OUT)),
        ),
        compiler_params=pltpu.CompilerParams(
            dimension_semantics=("parallel",)),    # megacore split on v7x
    )(xp, w1p, b1, gamma, beta, w2p, b2, w3p, b3p)

    return out[:B, :out_dim]


def init_params(key, input_dim=5, hidden=HIDDEN, output_dim=6):
    """Deterministic synthetic params. Linear weights stored as (in, out), f32."""
    ks = jax.random.split(key, 6)

    def linear(kw, kb, fan_in, fan_out):
        bound = 1.0 / jnp.sqrt(fan_in)
        w = jax.random.uniform(kw, (fan_in, fan_out), jnp.float32, -bound, bound)
        b = jax.random.uniform(kb, (1, fan_out), jnp.float32, -bound, bound)
        return w, b

    w1, b1 = linear(ks[0], ks[1], input_dim, hidden)
    gamma = jnp.ones((1, hidden), jnp.float32)
    beta = jnp.zeros((1, hidden), jnp.float32)
    w2, b2 = linear(ks[2], ks[3], hidden, hidden)
    w3, b3 = linear(ks[4], ks[5], hidden, output_dim)
    return (w1, b1, gamma, beta, w2, b2, w3, b3)


def qnetwork_ref(x, params):
    """Pure-JAX f32 reference matching the PyTorch module semantics."""
    w1, b1, gamma, beta, w2, b2, w3, b3 = params
    h = x @ w1 + b1
    mu = jnp.mean(h, axis=-1, keepdims=True)
    var = jnp.mean((h - mu) ** 2, axis=-1, keepdims=True)
    h = (h - mu) / jnp.sqrt(var + LN_EPS)
    h = h * gamma + beta
    h = jnp.maximum(h, 0.0)
    h = jnp.maximum(h @ w2 + b2, 0.0)
    return h @ w3 + b3


if __name__ == "__main__":
    key = jax.random.PRNGKey(0)
    k_x, k_p = jax.random.split(key)

    B, INPUT_DIM, OUTPUT_DIM = 8, 5, 6
    x = jax.random.normal(k_x, (B, INPUT_DIM), jnp.float32)
    params = init_params(k_p, INPUT_DIM, HIDDEN, OUTPUT_DIM)

    out = qnetwork_forward(x, params)
    out = jax.block_until_ready(out)

    # Reference using the same bf16-quantized weight values the kernel sees
    # (remaining delta is only activation rounding + accumulation order).
    w1, b1, gamma, beta, w2, b2, w3, b3 = params
    q = lambda w: w.astype(jnp.bfloat16).astype(jnp.float32)
    params_q = (q(w1), b1, gamma, beta, q(w2), b2, q(w3), b3)
    ref = qnetwork_ref(x, params_q)

    assert out.shape == (B, OUTPUT_DIM), out.shape
    err = float(jnp.max(jnp.abs(out - ref)))
    assert err < 5e-2, err

    print("KERNEL_OK")
</pallas_src>

<mosaic_0001>
module attributes {stable_mosaic.version = 11 : i64} {
  func.func @qnet_kernel(%arg0: i32, %arg1: memref<8x8xf32, #tpu.memory_space<vmem>>, %arg2: memref<8x512xbf16, #tpu.memory_space<vmem>>, %arg3: memref<1x512xf32, #tpu.memory_space<vmem>>, %arg4: memref<1x512xf32, #tpu.memory_space<vmem>>, %arg5: memref<1x512xf32, #tpu.memory_space<vmem>>, %arg6: memref<512x512xbf16, #tpu.memory_space<vmem>>, %arg7: memref<1x512xf32, #tpu.memory_space<vmem>>, %arg8: memref<512x128xbf16, #tpu.memory_space<vmem>>, %arg9: memref<1x128xf32, #tpu.memory_space<vmem>>, %arg10: memref<8x128xf32, #tpu.memory_space<vmem>>) attributes {dimension_semantics = [#tpu.dimension_semantics<parallel>], iteration_bounds = array<i64: 1>, scalar_prefetch = 0 : i64, scratch_operands = 0 : i64, tpu.core_type = #tpu.core_type<tc>, window_params = [{transform_indices = @transform_0, window_bounds = array<i64: 8, 8>}, {pipeline_mode = #tpu.pipeline_mode<synchronous>, transform_indices = @transform_1, window_bounds = array<i64: 8, 512>}, {pipeline_mode = #tpu.pipeline_mode<synchronous>, transform_indices = @transform_2, window_bounds = array<i64: 1, 512>}, {pipeline_mode = #tpu.pipeline_mode<synchronous>, transform_indices = @transform_3, window_bounds = array<i64: 1, 512>}, {pipeline_mode = #tpu.pipeline_mode<synchronous>, transform_indices = @transform_4, window_bounds = array<i64: 1, 512>}, {pipeline_mode = #tpu.pipeline_mode<synchronous>, transform_indices = @transform_5, window_bounds = array<i64: 512, 512>}, {pipeline_mode = #tpu.pipeline_mode<synchronous>, transform_indices = @transform_6, window_bounds = array<i64: 1, 512>}, {pipeline_mode = #tpu.pipeline_mode<synchronous>, transform_indices = @transform_7, window_bounds = array<i64: 512, 128>}, {pipeline_mode = #tpu.pipeline_mode<synchronous>, transform_indices = @transform_8, window_bounds = array<i64: 1, 128>}, {transform_indices = @transform_9, window_bounds = array<i64: 8, 128>}]} {
    %c0 = arith.constant 0 : index
    %c0_0 = arith.constant 0 : index
    %0 = vector.load %arg1[%c0, %c0_0] : memref<8x8xf32, #tpu.memory_space<vmem>>, vector<8x8xf32>
    %1 = arith.truncf %0 : vector<8x8xf32> to vector<8x8xbf16>
    %c0_1 = arith.constant 0 : index
    %c0_2 = arith.constant 0 : index
    %2 = vector.load %arg2[%c0_1, %c0_2] : memref<8x512xbf16, #tpu.memory_space<vmem>>, vector<8x512xbf16>
    %cst = arith.constant dense<0.000000e+00> : vector<8x512xf32>
    %3 = tpu.matmul %1, %2, %cst {dimension_numbers = #tpu.dot_dimension_numbers<[1], [0], [0], [1], [0, 0, 1, 1], [], []>} : vector<8x8xbf16>, vector<8x512xbf16>, vector<8x512xf32> -> vector<8x512xf32>
    %c0_3 = arith.constant 0 : index
    %c0_4 = arith.constant 0 : index
    %4 = vector.load %arg3[%c0_3, %c0_4] : memref<1x512xf32, #tpu.memory_space<vmem>>, vector<1x512xf32>
    %5 = vector.broadcast %4 : vector<1x512xf32> to vector<8x512xf32>
    %6 = arith.addf %3, %5 : vector<8x512xf32>
    %cst_5 = arith.constant dense<0.000000e+00> : vector<8xf32>
    %7 = vector.multi_reduction <add>, %6, %cst_5 [1] : vector<8x512xf32> to vector<8xf32>
    %8 = vector.shape_cast %7 : vector<8xf32> to vector<8x1xf32>
    %9 = arith.mulf %6, %6 : vector<8x512xf32>
    %cst_6 = arith.constant dense<0.000000e+00> : vector<8xf32>
    %10 = vector.multi_reduction <add>, %9, %cst_6 [1] : vector<8x512xf32> to vector<8xf32>
    %11 = vector.shape_cast %10 : vector<8xf32> to vector<8x1xf32>
    %cst_7 = arith.constant 0.001953125 : f32
    %12 = vector.broadcast %cst_7 : f32 to vector<8x1xf32>
    %13 = arith.mulf %8, %12 : vector<8x1xf32>
    %cst_8 = arith.constant 0.001953125 : f32
    %14 = vector.broadcast %cst_8 : f32 to vector<8x1xf32>
    %15 = arith.mulf %11, %14 : vector<8x1xf32>
    %16 = arith.mulf %13, %13 : vector<8x1xf32>
    %17 = arith.subf %15, %16 : vector<8x1xf32>
    %cst_9 = arith.constant 0.000000e+00 : f32
    %18 = vector.broadcast %cst_9 : f32 to vector<8x1xf32>
    %19 = arith.maximumf %17, %18 : vector<8x1xf32>
    %20 = vector.broadcast %13 : vector<8x1xf32> to vector<8x512xf32>
    %21 = arith.subf %6, %20 : vector<8x512xf32>
    %cst_10 = arith.constant 9.99999974E-6 : f32
    %22 = vector.broadcast %cst_10 : f32 to vector<8x1xf32>
    %23 = arith.addf %19, %22 : vector<8x1xf32>
    %24 = math.rsqrt %23 : vector<8x1xf32>
    %25 = vector.broadcast %24 : vector<8x1xf32> to vector<8x512xf32>
    %26 = arith.mulf %21, %25 : vector<8x512xf32>
    %c0_11 = arith.constant 0 : index
    %c0_12 = arith.constant 0 : index
    %27 = vector.load %arg4[%c0_11, %c0_12] : memref<1x512xf32, #tpu.memory_space<vmem>>, vector<1x512xf32>
    %28 = vector.broadcast %27 : vector<1x512xf32> to vector<8x512xf32>
    %29 = arith.mulf %26, %28 : vector<8x512xf32>
    %c0_13 = arith.constant 0 : index
    %c0_14 = arith.constant 0 : index
    %30 = vector.load %arg5[%c0_13, %c0_14] : memref<1x512xf32, #tpu.memory_space<vmem>>, vector<1x512xf32>
    %31 = vector.broadcast %30 : vector<1x512xf32> to vector<8x512xf32>
    %32 = arith.addf %29, %31 : vector<8x512xf32>
    %cst_15 = arith.constant 0.000000e+00 : f32
    %33 = vector.broadcast %cst_15 : f32 to vector<8x512xf32>
    %34 = arith.maximumf %32, %33 : vector<8x512xf32>
    %35 = arith.truncf %34 : vector<8x512xf32> to vector<8x512xbf16>
    %c0_16 = arith.constant 0 : index
    %c0_17 = arith.constant 0 : index
    %36 = vector.load %arg6[%c0_16, %c0_17] : memref<512x512xbf16, #tpu.memory_space<vmem>>, vector<512x512xbf16>
    %cst_18 = arith.constant dense<0.000000e+00> : vector<8x512xf32>
    %37 = tpu.matmul %35, %36, %cst_18 {dimension_numbers = #tpu.dot_dimension_numbers<[1], [0], [0], [1], [0, 0, 1, 1], [], []>} : vector<8x512xbf16>, vector<512x512xbf16>, vector<8x512xf32> -> vector<8x512xf32>
    %c0_19 = arith.constant 0 : index
    %c0_20 = arith.constant 0 : index
    %38 = vector.load %arg7[%c0_19, %c0_20] : memref<1x512xf32, #tpu.memory_space<vmem>>, vector<1x512xf32>
    %39 = vector.broadcast %38 : vector<1x512xf32> to vector<8x512xf32>
    %40 = arith.addf %37, %39 : vector<8x512xf32>
    %cst_21 = arith.constant 0.000000e+00 : f32
    %41 = vector.broadcast %cst_21 : f32 to vector<8x512xf32>
    %42 = arith.maximumf %40, %41 : vector<8x512xf32>
    %43 = arith.truncf %42 : vector<8x512xf32> to vector<8x512xbf16>
    %c0_22 = arith.constant 0 : index
    %c0_23 = arith.constant 0 : index
    %44 = vector.load %arg8[%c0_22, %c0_23] : memref<512x128xbf16, #tpu.memory_space<vmem>>, vector<512x128xbf16>
    %cst_24 = arith.constant dense<0.000000e+00> : vector<8x128xf32>
    %45 = tpu.matmul %43, %44, %cst_24 {dimension_numbers = #tpu.dot_dimension_numbers<[1], [0], [0], [1], [0, 0, 1, 1], [], []>} : vector<8x512xbf16>, vector<512x128xbf16>, vector<8x128xf32> -> vector<8x128xf32>
    %c0_25 = arith.constant 0 : index
    %c0_26 = arith.constant 0 : index
    %46 = vector.load %arg9[%c0_25, %c0_26] : memref<1x128xf32, #tpu.memory_space<vmem>>, vector<1x128xf32>
    %47 = vector.broadcast %46 : vector<1x128xf32> to vector<8x128xf32>
    %48 = arith.addf %45, %47 : vector<8x128xf32>
    %c0_27 = arith.constant 0 : index
    %c0_28 = arith.constant 0 : index
    %49 = vector.load %arg10[%c0_27, %c0_28] : memref<8x128xf32, #tpu.memory_space<vmem>>, vector<8x128xf32>
    tpu.vector_store %arg10[%c0_27, %c0_28], %48 {strides = array<i32>} : memref<8x128xf32, #tpu.memory_space<vmem>>, vector<8x128xf32>,
    return
  }
  func.func @transform_0(%arg0: i32) -> (i32, i32) {
    %c0_i32 = arith.constant 0 : i32
    %c0_i32_0 = arith.constant 0 : i32
    return %arg0, %c0_i32 : i32, i32
  }
  func.func @transform_1(%arg0: i32) -> (i32, i32) {
    %c0_i32 = arith.constant 0 : i32
    %c0_i32_0 = arith.constant 0 : i32
    %c0_i32_1 = arith.constant 0 : i32
    return %c0_i32, %c0_i32_0 : i32, i32
  }
  func.func @transform_2(%arg0: i32) -> (i32, i32) {
    %c0_i32 = arith.constant 0 : i32
    %c0_i32_0 = arith.constant 0 : i32
    %c0_i32_1 = arith.constant 0 : i32
    return %c0_i32, %c0_i32_0 : i32, i32
  }
  func.func @transform_3(%arg0: i32) -> (i32, i32) {
    %c0_i32 = arith.constant 0 : i32
    %c0_i32_0 = arith.constant 0 : i32
    %c0_i32_1 = arith.constant 0 : i32
    return %c0_i32, %c0_i32_0 : i32, i32
  }
  func.func @transform_4(%arg0: i32) -> (i32, i32) {
    %c0_i32 = arith.constant 0 : i32
    %c0_i32_0 = arith.constant 0 : i32
    %c0_i32_1 = arith.constant 0 : i32
    return %c0_i32, %c0_i32_0 : i32, i32
  }
  func.func @transform_5(%arg0: i32) -> (i32, i32) {
    %c0_i32 = arith.constant 0 : i32
    %c0_i32_0 = arith.constant 0 : i32
    %c0_i32_1 = arith.constant 0 : i32
    return %c0_i32, %c0_i32_0 : i32, i32
  }
  func.func @transform_6(%arg0: i32) -> (i32, i32) {
    %c0_i32 = arith.constant 0 : i32
    %c0_i32_0 = arith.constant 0 : i32
    %c0_i32_1 = arith.constant 0 : i32
    return %c0_i32, %c0_i32_0 : i32, i32
  }
  func.func @transform_7(%arg0: i32) -> (i32, i32) {
    %c0_i32 = arith.constant 0 : i32
    %c0_i32_0 = arith.constant 0 : i32
    %c0_i32_1 = arith.constant 0 : i32
    return %c0_i32, %c0_i32_0 : i32, i32
  }
  func.func @transform_8(%arg0: i32) -> (i32, i32) {
    %c0_i32 = arith.constant 0 : i32
    %c0_i32_0 = arith.constant 0 : i32
    %c0_i32_1 = arith.constant 0 : i32
    return %c0_i32, %c0_i32_0 : i32, i32
  }
  func.func @transform_9(%arg0: i32) -> (i32, i32) {
    %c0_i32 = arith.constant 0 : i32
    %c0_i32_0 = arith.constant 0 : i32
    return %arg0, %c0_i32 : i32, i32
  }
}

</mosaic_0001>

<bundles_post_ra>
// kernel: tpu_custom_call.1
= control target key start
LH: loop header
LB: loop body
LE: loop exit
PB: predicated region body
PF: predicated region fallthrough
CT: control target
= control target key end

     0   :  { %14 = vsyncpa [#allocation3], 0  ;;  %s2401_s0 = inlined_call_operand.hbm [shape: f32[8,8], index: 0, kind: input, shape index: {}]   ;;  %s2402_s1 = inlined_call_operand.hbm [shape: bf16[8,512], index: 1, kind: input, shape index: {}]   ;;  %s2403_s2 = inlined_call_operand.vmem [shape: f32[1,512], index: 2, kind: input, shape index: {}]   ;;  %s2404_s3 = inlined_call_operand.vmem [shape: f32[1,512], index: 3, kind: input, shape index: {}]   ;;  %s2405_s4 = inlined_call_operand.vmem [shape: f32[1,512], index: 4, kind: input, shape index: {}]   ;;  %s2406_s5 = inlined_call_operand.hbm [shape: bf16[512,512], index: 5, kind: input, shape index: {}]   ;;  %s2407_s6 = inlined_call_operand.vmem [shape: f32[1,512], index: 6, kind: input, shape index: {}]   ;;  %s2408_s7 = inlined_call_operand.hbm [shape: bf16[512,128], index: 7, kind: input, shape index: {}]   ;;  %s2409_s8 = inlined_call_operand.vmem [shape: f32[1,128], index: 8, kind: input, shape index: {}]   ;;  %s2410_s9 = inlined_call_operand.hbm [shape: f32[8,128], index: 9, kind: output, shape index: {}]  }
   0x1   :  { %15 = vsyncpa [#allocation6], 0 }
   0x2   :  { %16 = vsyncpa [#allocation9], 0 }
   0x3   :  { %17 = vsyncpa [#allocation4], 0  ;;  %s2215_s30 = smov [#allocation5]   ;;  %s2216_s11 = smov [#allocation2]  }
   0x4   :  { %s34_s10 = sshll.u32 %s2215_s30, 4  ;;  %s24_s12 = sshll.u32 %s2216_s11, 4  ;;  %s35_s10 = int_to_ptr.vmem [resolvable:$true] %s34_s10  ;;  %s25_s12 = int_to_ptr.vmem [resolvable:$true] %s24_s12 }
   0x5   :  { %s2097_s15 = scalar_lea.hbm %s2402_s1, 256 }
   0x6   :  { %p2098_p0 = scmp.ne.s32.totalorder %s2402_s1, %s2097_s15  ;;  %p2101_p1 = scmp.lt.u32.totalorder %s2097_s15, %s2402_s1 }
   0x8   :  { %p2103_p2 = pnand %p2101_p1, %p2098_p0 }
   0xa   :  { %2106 = shalt.err (!%p2103_p2)
}
   0xb   :  { %s2107_s20 = scalar_lea.vmem %s35_s10, 256  ;;  %p2112_p4 = scmp.lt.s32.totalorder %s35_s10, %s35_s10 }
   0xc   :  { %p2108_p3 = scmp.ne.s32.totalorder %s35_s10, %s2107_s20  ;;  %p2113_p5 = scmp.lt.s32.totalorder %s2107_s20, %s2107_s20 }
   0xe   :  { %p2114_p6 = por %p2113_p5, %p2112_p4 }
  0x10   :  { %p2115_p7 = pnand %p2114_p6, %p2108_p3 }
  0x12   :  { %2118 = shalt.err (!%p2115_p7)
}
  0x13   :  { %37 = dma.hbm_to_vmem [thread:$0]  %s2402_s1, 256, %s35_s10, [#allocation6]  }
  0x14   :  { %s2119_s25 = scalar_lea.hbm %s2401_s0, 128 }
  0x15   :  { %p2120_p8 = scmp.ne.s32.totalorder %s2401_s0, %s2119_s25  ;;  %p2123_p9 = scmp.lt.u32.totalorder %s2119_s25, %s2401_s0 }
  0x17   :  { %p2125_p10 = pnand %p2123_p9, %p2120_p8 }
  0x19   :  { %2128 = shalt.err (!%p2125_p10)
}
  0x1a   :  { %s2129_s30 = scalar_lea.vmem %s25_s12, 128  ;;  %p2134_p12 = scmp.lt.s32.totalorder %s25_s12, %s25_s12 }
  0x1b   :  { %p2130_p11 = scmp.ne.s32.totalorder %s25_s12, %s2129_s30  ;;  %p2135_p13 = scmp.lt.s32.totalorder %s2129_s30, %s2129_s30 }
  0x1d   :  { %p2136_p0 = por %p2135_p13, %p2134_p12 }
  0x1f   :  { %p2137_p1 = pnand %p2136_p0, %p2130_p11 }
  0x21   :  { %2140 = shalt.err (!%p2137_p1)
}
  0x22   :  { %27 = dma.hbm_to_vmem [thread:$0]  %s2401_s0, 128, %s25_s12, [#allocation3]  }
  0x23   :  { %s2217_s11 = smov [#allocation7]   ;;  %s2141_s16 = scalar_lea.hbm %s2406_s5, 16384 }
  0x24   :  { %s49_s13 = sshll.u32 %s2217_s11, 4  ;;  %p2142_p2 = scmp.ne.s32.totalorder %s2406_s5, %s2141_s16  ;;  %s50_s13 = int_to_ptr.vmem [resolvable:$true] %s49_s13 }
  0x25   :  { %p2145_p3 = scmp.lt.u32.totalorder %s2141_s16, %s2406_s5 }
  0x27   :  { %p2147_p4 = pnand %p2145_p3, %p2142_p2 }
  0x29   :  { %2150 = shalt.err (!%p2147_p4)
}
  0x2a   :  { %s2151_s21 = scalar_lea.vmem %s50_s13, 16384  ;;  %p2156_p6 = scmp.lt.s32.totalorder %s50_s13, %s50_s13 }
  0x2b   :  { %p2152_p5 = scmp.ne.s32.totalorder %s50_s13, %s2151_s21  ;;  %p2157_p7 = scmp.lt.s32.totalorder %s2151_s21, %s2151_s21 }
  0x2d   :  { %p2158_p8 = por %p2157_p7, %p2156_p6 }
  0x2f   :  { %p2159_p9 = pnand %p2158_p8, %p2152_p5 }
  0x31   :  { %2162 = shalt.err (!%p2159_p9)
}
  0x32   :  { %s2218_s0 = smov 256   ;;  %s2219_s12 = smov 16  }
  0x33   :  { %55 = dma.hbm_to_vmem [thread:$0]  %s2406_s5, 16384, %s50_s13, [#allocation6], %s2218_s0, %s2218_s0, %s2219_s12  }
  0x34   :  { %s2220_s24 = smov [#allocation8]   ;;  %s2163_s28 = scalar_lea.hbm %s2408_s7, 4096 }
  0x35   :  { %s63_s25 = sshll.u32 %s2220_s24, 4  ;;  %p2164_p10 = scmp.ne.s32.totalorder %s2408_s7, %s2163_s28  ;;  %s64_s25 = int_to_ptr.vmem [resolvable:$true] %s63_s25 }
  0x36   :  { %p2167_p11 = scmp.lt.u32.totalorder %s2163_s28, %s2408_s7 }
  0x38   :  { %p2169_p12 = pnand %p2167_p11, %p2164_p10 }
  0x3a   :  { %2172 = shalt.err (!%p2169_p12)
}
  0x3b   :  { %s2173_s11 = scalar_lea.vmem %s64_s25, 4096  ;;  %p2178_p0 = scmp.lt.s32.totalorder %s64_s25, %s64_s25 }
  0x3c   :  { %p2174_p13 = scmp.ne.s32.totalorder %s64_s25, %s2173_s11  ;;  %p2179_p1 = scmp.lt.s32.totalorder %s2173_s11, %s2173_s11 }
  0x3e   :  { %p2180_p2 = por %p2179_p1, %p2178_p0 }
  0x40   :  { %p2181_p3 = pnand %p2180_p2, %p2174_p13 }
  0x42   :  { %2184 = shalt.err (!%p2181_p3)
}
  0x43   :  { %s2221_s5 = smov 64   ;;  %s2222_s13 = smov 4  }
  0x44   :  { %69 = dma.hbm_to_vmem [thread:$0]  %s2408_s7, 4096, %s64_s25, [#allocation9], %s2221_s5, %s2221_s5, %s2222_s13  }
  0x45   :  { %2207 = dma.done.wait [#allocation3], 128  }
  0x46   :  { %2208 = vsyncadd [#allocation3], 4294967168 }
  0x47   :  { %2209 = dma.done.wait [#allocation6], 16640  }
  0x48   :  { %2210 = vsyncadd [#allocation6], 4294950656 }
  0x49   :  { %2211 = dma.done.wait [#allocation9], 4096  }
  0x4a   :  { %2212 = vsyncadd [#allocation9], 4294963200  ;;  %v2223_v0 = vmov 0   ;;  %v87_v1 = vld [vmem:[#allocation5] sm:$0xff]  ;;  %vm125_vm0 = vcmask 1043456   ;;  %v88_v2 = vld [vmem:[#allocation5 + $0x8] sm:$0xff]  ;;  %v91_v43 = vlaneseq }
  0x4b   :  { %170 = vmatprep.mubr.bf16.mxu0 %v2223_v0  ;;  %211 = vmatprep.mubr.bf16.mxu1 %v2223_v0  ;;  %v85_v3 = vld [vmem:[#allocation2] sm:$0xff]  ;;  %v1633_v4 = vcombine.high %v87_v1, %v87_v1  ;;  %v1635_v5 = vcombine.high %v88_v2, %v88_v2  ;;  %v1632_v6 = vcombine.low %v87_v1, %v87_v1  ;;  %vm121_vm1 = vcmask 64512   ;;  %v1871_v11 = vld [vmem:[#allocation7] ss:$16 sps:$4 sm:$0xff]   ;;  %v1873_v12 = vld [vmem:[#allocation7 + $0x4] ss:$16 sps:$4 sm:$0xff]  }
  0x4c   :  { %v1634_v7 = vcombine.low %v88_v2, %v88_v2  ;;  %v86_v10 = vpack.c.bf16 %v85_v3, %v85_v3  ;;  %v1874_v13 = vld [vmem:[#allocation7 + $0x8] ss:$16 sps:$4 sm:$0xff]   ;;  %v1876_v14 = vld [vmem:[#allocation7 + $0xc] ss:$16 sps:$4 sm:$0xff]   ;;  %v1879_v15 = vld [vmem:[#allocation7 + $0x24] ss:$16 sps:$4 sm:$0xff]  }
  0x4d   :  { %1636 = vmatprep.subr.msk.bf16.mxu0 %vm125_vm0, %v1633_v4  ;;  %1638 = vmatprep.subr.msk.bf16.mxu1 %vm125_vm0, %v1635_v5  ;;  %v127_v8 = vsel %vm125_vm0, %v1632_v6, 0  ;;  %v1882_v16 = vld [vmem:[#allocation7 + $0x2c] ss:$16 sps:$4 sm:$0xff]   ;;  %v1877_v17 = vld [vmem:[#allocation7 + $0x20] ss:$16 sps:$4 sm:$0xff]   ;;  %v92_v44 = vshrl.u32 %v91_v43, 7 }
  0x4e   :  { %v133_v9 = vsel %vm125_vm0, %v1634_v7, 0  ;;  %139 = vmatpush1.bf16.msra.mxu0 %v127_v8  ;;  %v1880_v18 = vld [vmem:[#allocation7 + $0x28] ss:$16 sps:$4 sm:$0xff]   ;;  %v1885_v19 = vld [vmem:[#allocation7 + $0x44] ss:$16 sps:$4 sm:$0xff]   ;;  %s2224_s21 = smov [#allocation10]  }
  0x4f   :  { %180 = vmatpush1.bf16.msra.mxu1 %v133_v9  ;;  %1099 = vmatprep.subr.bf16.mxu0 %v1873_v12  ;;  %v1888_v20 = vld [vmem:[#allocation7 + $0x4c] ss:$16 sps:$4 sm:$0xff]   ;;  %v1883_v21 = vld [vmem:[#allocation7 + $0x40] ss:$16 sps:$4 sm:$0xff]   ;;  %v1886_v22 = vld [vmem:[#allocation7 + $0x48] ss:$16 sps:$4 sm:$0xff]  }
  0x50   :  { %1181 = vmatprep.subr.bf16.mxu1 %v1876_v14  ;;  %v1891_v23 = vld [vmem:[#allocation7 + $0x64] ss:$16 sps:$4 sm:$0xff]   ;;  %v1894_v24 = vld [vmem:[#allocation7 + $0x6c] ss:$16 sps:$4 sm:$0xff]   ;;  %v1889_v25 = vld [vmem:[#allocation7 + $0x60] ss:$16 sps:$4 sm:$0xff]  }
  0x51   :  { %1637 = vmatmul.mubr.msk.bf16.vlgmr.msra.gmra.mrb[0].mxu0 %vm121_vm1, %v86_v10  ;;  %v1892_v26 = vld [vmem:[#allocation7 + $0x68] ss:$16 sps:$4 sm:$0xff]   ;;  %v1897_v27 = vld [vmem:[#allocation7 + $0x84] ss:$16 sps:$4 sm:$0xff]   ;;  %v1900_v28 = vld [vmem:[#allocation7 + $0x8c] ss:$16 sps:$4 sm:$0xff]  }
  0x52   :  { %1639 = vmatmul.mubr.msk.bf16.vlgmr.msra.gmra.mrb[0].mxu1 %vm121_vm1, %v86_v10  ;;  %1100 = vmatpush1.bf16.msra.mxu0 %v1871_v11  ;;  %v1895_v29 = vld [vmem:[#allocation7 + $0x80] ss:$16 sps:$4 sm:$0xff]   ;;  %v1898_v30 = vld [vmem:[#allocation7 + $0x88] ss:$16 sps:$4 sm:$0xff]   ;;  %v1903_v31 = vld [vmem:[#allocation7 + $0xa4] ss:$16 sps:$4 sm:$0xff]  }
  0x53   :  { %1182 = vmatpush1.bf16.msra.mxu1 %v1874_v13  ;;  %1101 = vmatprep.subr.bf16.mxu0 %v1879_v15  ;;  %v1906_v32 = vld [vmem:[#allocation7 + $0xac] ss:$16 sps:$4 sm:$0xff]   ;;  %v1901_v33 = vld [vmem:[#allocation7 + $0xa0] ss:$16 sps:$4 sm:$0xff]   ;;  %v1904_v34 = vld [vmem:[#allocation7 + $0xa8] ss:$16 sps:$4 sm:$0xff]  }
  0x54   :  { %1183 = vmatprep.subr.bf16.mxu1 %v1882_v16  ;;  %v1909_v35 = vld [vmem:[#allocation7 + $0xc4] ss:$16 sps:$4 sm:$0xff]   ;;  %v1912_v36 = vld [vmem:[#allocation7 + $0xcc] ss:$16 sps:$4 sm:$0xff]   ;;  %v1907_v37 = vld [vmem:[#allocation7 + $0xc0] ss:$16 sps:$4 sm:$0xff]  }
  0x55   :  { %v1910_v38 = vld [vmem:[#allocation7 + $0xc8] ss:$16 sps:$4 sm:$0xff]   ;;  %v1915_v39 = vld [vmem:[#allocation7 + $0xe4] ss:$16 sps:$4 sm:$0xff]   ;;  %v1918_v40 = vld [vmem:[#allocation7 + $0xec] ss:$16 sps:$4 sm:$0xff]  }
  0x56   :  { %1102 = vmatpush1.bf16.msra.mxu0 %v1877_v17  ;;  %v1913_v41 = vld [vmem:[#allocation7 + $0xe0] ss:$16 sps:$4 sm:$0xff]   ;;  %v1916_v42 = vld [vmem:[#allocation7 + $0xe8] ss:$16 sps:$4 sm:$0xff]   ;;  %v2323_v45 = vsub.s32 0, %v92_v44  ;;  %v2325_v46 = vsub.s32 2, %v92_v44 }
  0x57   :  { %1184 = vmatpush1.bf16.msra.mxu1 %v1880_v18  ;;  %1103 = vmatprep.subr.bf16.mxu0 %v1885_v19  ;;  %v89_v47 = vld [vmem:[%s2403_s2] sm:$0xf]  ;;  %v2330_v48 = vsub.s32 1, %v92_v44  ;;  %v2335_v52 = vsub.s32 3, %v92_v44  ;;  %v1921_v12 = vld [vmem:[#allocation7 + $0x104] ss:$16 sps:$4 sm:$0xff]  }
  0x58   :  { %1185 = vmatprep.subr.bf16.mxu1 %v1888_v20  ;;  %v94_v49 = vrot.slane %v89_v47, %v2323_v45  ;;  %v102_v50 = vrot.slane %v89_v47, %v2325_v46  ;;  %v1924_v13 = vld [vmem:[#allocation7 + $0x10c] ss:$16 sps:$4 sm:$0xff]   ;;  %v1919_v14 = vld [vmem:[#allocation7 + $0x100] ss:$16 sps:$4 sm:$0xff]   ;;  %v1922_v15 = vld [vmem:[#allocation7 + $0x108] ss:$16 sps:$4 sm:$0xff]  }
  0x59   :  { %v98_v51 = vrot.slane %v89_v47, %v2330_v48  ;;  %v106_v60 = vrot.slane %v89_v47, %v2335_v52  ;;  %v1927_v16 = vld [vmem:[#allocation7 + $0x124] ss:$16 sps:$4 sm:$0xff]   ;;  %v1930_v17 = vld [vmem:[#allocation7 + $0x12c] ss:$16 sps:$4 sm:$0xff]   ;;  %v1925_v18 = vld [vmem:[#allocation7 + $0x120] ss:$16 sps:$4 sm:$0xff]  }
  0x5a   :  { %1104 = vmatpush1.bf16.msra.mxu0 %v1883_v21  ;;  %v1928_v19 = vld [vmem:[#allocation7 + $0x128] ss:$16 sps:$4 sm:$0xff]   ;;  %v1933_v20 = vld [vmem:[#allocation7 + $0x144] ss:$16 sps:$4 sm:$0xff]   ;;  %v1936_v21 = vld [vmem:[#allocation7 + $0x14c] ss:$16 sps:$4 sm:$0xff]  }
  0x5b   :  { %1186 = vmatpush1.bf16.msra.mxu1 %v1886_v22  ;;  %1105 = vmatprep.subr.bf16.mxu0 %v1891_v23  ;;  %v1931_v22 = vld [vmem:[#allocation7 + $0x140] ss:$16 sps:$4 sm:$0xff]   ;;  %v1934_v23 = vld [vmem:[#allocation7 + $0x148] ss:$16 sps:$4 sm:$0xff]   ;;  %v1969_v44 = vld [vmem:[#allocation7 + $0x204] ss:$16 sps:$4 sm:$0xff]  }
  0x5c   :  { %1187 = vmatprep.subr.bf16.mxu1 %v1894_v24  ;;  %v1939_v24 = vld [vmem:[#allocation7 + $0x164] ss:$16 sps:$4 sm:$0xff]   ;;  %v1964_v43 = vld [vmem:[#allocation7 + $0x1e8] ss:$16 sps:$4 sm:$0xff]   ;;  %v1972_v47 = vld [vmem:[#allocation7 + $0x20c] ss:$16 sps:$4 sm:$0xff]  }
  0x5d   :  { %s1621_s0 = sshll.u32 %s2224_s21, 4  ;;  %s1622_s0 = int_to_ptr.vmem [resolvable:$true] %s1621_s0 }
  0x5e   :  { %1106 = vmatpush1.bf16.msra.mxu0 %v1889_v25  ;;  %v1942_v25 = vld [vmem:[#allocation7 + $0x16c] ss:$16 sps:$4 sm:$0xff]   ;;  %s2185_s12 = scalar_lea.vmem %s1622_s0, 128  ;;  %p2190_p5 = scmp.lt.s32.totalorder %s1622_s0, %s1622_s0 }
  0x5f   :  { %1188 = vmatpush1.bf16.msra.mxu1 %v1892_v26  ;;  %1107 = vmatprep.subr.bf16.mxu0 %v1897_v27  ;;  %v1937_v26 = vld [vmem:[#allocation7 + $0x160] ss:$16 sps:$4 sm:$0xff]   ;;  %v1940_v27 = vld [vmem:[#allocation7 + $0x168] ss:$16 sps:$4 sm:$0xff]   ;;  %p2186_p4 = scmp.ne.s32.totalorder %s1622_s0, %s2185_s12  ;;  %p2191_p6 = scmp.lt.s32.totalorder %s2185_s12, %s2185_s12 }
  0x60   :  { %1189 = vmatprep.subr.bf16.mxu1 %v1900_v28  ;;  %v1945_v28 = vld [vmem:[#allocation7 + $0x184] ss:$16 sps:$4 sm:$0xff]  }
  0x61   :  { %p2192_p7 = por %p2191_p6, %p2190_p5 }
  0x62   :  { %1108 = vmatpush1.bf16.msra.mxu0 %v1895_v29  ;;  %v1948_v29 = vld [vmem:[#allocation7 + $0x18c] ss:$16 sps:$4 sm:$0xff]  }
  0x63   :  { %1190 = vmatpush1.bf16.msra.mxu1 %v1898_v30  ;;  %1109 = vmatprep.subr.bf16.mxu0 %v1903_v31  ;;  %v1943_v30 = vld [vmem:[#allocation7 + $0x180] ss:$16 sps:$4 sm:$0xff]   ;;  %v1946_v31 = vld [vmem:[#allocation7 + $0x188] ss:$16 sps:$4 sm:$0xff]   ;;  %p2193_p8 = pnand %p2192_p7, %p2186_p4 }
  0x64   :  { %1191 = vmatprep.subr.bf16.mxu1 %v1906_v32  ;;  %v1951_v32 = vld [vmem:[#allocation7 + $0x1a4] ss:$16 sps:$4 sm:$0xff]  }
  0x66   :  { %1110 = vmatpush1.bf16.msra.mxu0 %v1901_v33  ;;  %v1954_v33 = vld [vmem:[#allocation7 + $0x1ac] ss:$16 sps:$4 sm:$0xff]  }
  0x67   :  { %1192 = vmatpush1.bf16.msra.mxu1 %v1904_v34  ;;  %1111 = vmatprep.subr.bf16.mxu0 %v1909_v35  ;;  %v1949_v34 = vld [vmem:[#allocation7 + $0x1a0] ss:$16 sps:$4 sm:$0xff]   ;;  %v1952_v35 = vld [vmem:[#allocation7 + $0x1a8] ss:$16 sps:$4 sm:$0xff]  }
  0x68   :  { %1193 = vmatprep.subr.bf16.mxu1 %v1912_v36  ;;  %v1957_v36 = vld [vmem:[#allocation7 + $0x1c4] ss:$16 sps:$4 sm:$0xff]  }
  0x6a   :  { %1112 = vmatpush1.bf16.msra.mxu0 %v1907_v37  ;;  %v1960_v37 = vld [vmem:[#allocation7 + $0x1cc] ss:$16 sps:$4 sm:$0xff]  }
  0x6b   :  { %1194 = vmatpush1.bf16.msra.mxu1 %v1910_v38  ;;  %1113 = vmatprep.subr.bf16.mxu0 %v1915_v39  ;;  %v1955_v38 = vld [vmem:[#allocation7 + $0x1c0] ss:$16 sps:$4 sm:$0xff]   ;;  %v1958_v39 = vld [vmem:[#allocation7 + $0x1c8] ss:$16 sps:$4 sm:$0xff]  }
  0x6c   :  { %1195 = vmatprep.subr.bf16.mxu1 %v1918_v40  ;;  %v1963_v40 = vld [vmem:[#allocation7 + $0x1e4] ss:$16 sps:$4 sm:$0xff]  }
  0x6e   :  { %1114 = vmatpush1.bf16.msra.mxu0 %v1913_v41  ;;  %v1966_v41 = vld [vmem:[#allocation7 + $0x1ec] ss:$16 sps:$4 sm:$0xff]  }
  0x6f   :  { %1196 = vmatpush1.bf16.msra.mxu1 %v1916_v42  ;;  %1115 = vmatprep.subr.bf16.mxu0 %v1921_v12  ;;  %v1961_v42 = vld [vmem:[#allocation7 + $0x1e0] ss:$16 sps:$4 sm:$0xff]  }
  0x70   :  { %1197 = vmatprep.subr.bf16.mxu1 %v1924_v13 }
  0x72   :  { %1116 = vmatpush1.bf16.msra.mxu0 %v1919_v14 }
  0x73   :  { %1198 = vmatpush1.bf16.msra.mxu1 %v1922_v15  ;;  %1117 = vmatprep.subr.bf16.mxu0 %v1927_v16 }
  0x74   :  { %1199 = vmatprep.subr.bf16.mxu1 %v1930_v17 }
  0x76   :  { %1118 = vmatpush1.bf16.msra.mxu0 %v1925_v18 }
  0x77   :  { %1200 = vmatpush1.bf16.msra.mxu1 %v1928_v19  ;;  %1119 = vmatprep.subr.bf16.mxu0 %v1933_v20 }
  0x78   :  { %1201 = vmatprep.subr.bf16.mxu1 %v1936_v21 }
  0x7a   :  { %1120 = vmatpush1.bf16.msra.mxu0 %v1931_v22 }
  0x7b   :  { %1202 = vmatpush1.bf16.msra.mxu1 %v1934_v23  ;;  %1121 = vmatprep.subr.bf16.mxu0 %v1939_v24 }
  0x7c   :  { %1203 = vmatprep.subr.bf16.mxu1 %v1942_v25  ;;  %v1967_v25 = vld [vmem:[#allocation7 + $0x200] ss:$16 sps:$4 sm:$0xff]  }
  0x7e   :  { %1122 = vmatpush1.bf16.msra.mxu0 %v1937_v26  ;;  %v1970_v26 = vld [vmem:[#allocation7 + $0x208] ss:$16 sps:$4 sm:$0xff]  }
  0x7f   :  { %1204 = vmatpush1.bf16.msra.mxu1 %v1940_v27  ;;  %1123 = vmatprep.subr.bf16.mxu0 %v1945_v28  ;;  %v1975_v28 = vld [vmem:[#allocation7 + $0x224] ss:$16 sps:$4 sm:$0xff]  }
  0x80   :  { %1205 = vmatprep.subr.bf16.mxu1 %v1948_v29  ;;  %v1978_v29 = vld [vmem:[#allocation7 + $0x22c] ss:$16 sps:$4 sm:$0xff]  }
  0x82   :  { %1124 = vmatpush1.bf16.msra.mxu0 %v1943_v30 }
  0x83   :  { %1206 = vmatpush1.bf16.msra.mxu1 %v1946_v31  ;;  %1125 = vmatprep.subr.bf16.mxu0 %v1951_v32  ;;  %v1973_v31 = vld [vmem:[#allocation7 + $0x220] ss:$16 sps:$4 sm:$0xff]   ;;  %v1976_v32 = vld [vmem:[#allocation7 + $0x228] ss:$16 sps:$4 sm:$0xff]  }
  0x84   :  { %1207 = vmatprep.subr.bf16.mxu1 %v1954_v33  ;;  %v1981_v33 = vld [vmem:[#allocation7 + $0x244] ss:$16 sps:$4 sm:$0xff]  }
  0x86   :  { %1126 = vmatpush1.bf16.msra.mxu0 %v1949_v34  ;;  %v1984_v34 = vld [vmem:[#allocation7 + $0x24c] ss:$16 sps:$4 sm:$0xff]  }
  0x87   :  { %1208 = vmatpush1.bf16.msra.mxu1 %v1952_v35  ;;  %1127 = vmatprep.subr.bf16.mxu0 %v1957_v36  ;;  %v1979_v35 = vld [vmem:[#allocation7 + $0x240] ss:$16 sps:$4 sm:$0xff]   ;;  %v1982_v36 = vld [vmem:[#allocation7 + $0x248] ss:$16 sps:$4 sm:$0xff]  }
  0x88   :  { %1209 = vmatprep.subr.bf16.mxu1 %v1960_v37  ;;  %v1987_v37 = vld [vmem:[#allocation7 + $0x264] ss:$16 sps:$4 sm:$0xff]  }
  0x8a   :  { %1128 = vmatpush1.bf16.msra.mxu0 %v1955_v38  ;;  %v1990_v38 = vld [vmem:[#allocation7 + $0x26c] ss:$16 sps:$4 sm:$0xff]  }
  0x8b   :  { %1210 = vmatpush1.bf16.msra.mxu1 %v1958_v39  ;;  %1129 = vmatprep.subr.bf16.mxu0 %v1963_v40  ;;  %v1985_v39 = vld [vmem:[#allocation7 + $0x260] ss:$16 sps:$4 sm:$0xff]   ;;  %v1988_v40 = vld [vmem:[#allocation7 + $0x268] ss:$16 sps:$4 sm:$0xff]  }
  0x8c   :  { %1211 = vmatprep.subr.bf16.mxu1 %v1966_v41  ;;  %v1993_v41 = vld [vmem:[#allocation7 + $0x284] ss:$16 sps:$4 sm:$0xff]  }
  0x8e   :  { %1130 = vmatpush1.bf16.msra.mxu0 %v1961_v42  ;;  %v1996_v42 = vld [vmem:[#allocation7 + $0x28c] ss:$16 sps:$4 sm:$0xff]  }
  0x8f   :  { %1212 = vmatpush1.bf16.msra.mxu1 %v1964_v43  ;;  %1140 = vmatprep.subr.bf16.mxu0 %v1969_v44  ;;  %v1991_v43 = vld [vmem:[#allocation7 + $0x280] ss:$16 sps:$4 sm:$0xff]   ;;  %v1994_v44 = vld [vmem:[#allocation7 + $0x288] ss:$16 sps:$4 sm:$0xff]  }
  0x90   :  { %1222 = vmatprep.subr.bf16.mxu1 %v1972_v47  ;;  %v1999_v47 = vld [vmem:[#allocation7 + $0x2a4] ss:$16 sps:$4 sm:$0xff]  }
 0x124   :  { %v172_v53 = vpop.f32.mrb[0].mxu0 }
 0x125   :  { %v213_v54 = vpop.f32.mrb[0].mxu1  ;;  %v2337_v55 = vadd.f32 %v172_v53, %v94_v49  ;;  %v174_v57 = vpop.f32.mrb[1].mxu0 }
 0x126   :  { %v2339_v56 = vadd.f32 %v213_v54, %v102_v50  ;;  %v215_v58 = vpop.f32.mrb[1].mxu1  ;;  %v2341_v59 = vadd.f32 %v174_v57, %v98_v51  ;;  %v176_v61 = vpop.f32.mrb[2].mxu0 }
 0x127   :  { %v217_v62 = vpop.f32.mrb[2].mxu1  ;;  %v225_v63 = vmul.f32 %v2337_v55, %v2337_v55  ;;  %v177_v0 = vpop.f32.mrb[3].mxu0  ;;  %v2352_v5 = vadd.f32 %v215_v58, %v106_v60  ;;  %v249_v61 = vld [vmem:[%s2404_s3] sm:$0xf] }
 0x128   :  { %v218_v1 = vpop.f32.mrb[3].mxu1  ;;  %v227_v2 = vmul.f32 %v2339_v56, %v2339_v56  ;;  %v226_v3 = vmul.f32 %v2341_v59, %v2341_v59  ;;  %v220_v4 = vadd.f32 %v2341_v59, %v2337_v55  ;;  %v275_v62 = vld [vmem:[%s2405_s4] sm:$0xf]  ;;  %v254_v0 = vrot.slane %v249_v61, %v2323_v45 }
 0x129   :  { %v228_v10 = vmul.f32 %v2352_v5, %v2352_v5  ;;  %v266_v1 = vrot.slane %v249_v61, %v2335_v52  ;;  %v288_v12 = vrot.slane %v275_v62, %v2325_v46 }
 0x12a   :  { %v221_v6 = vadd.f32 %v220_v4, %v2339_v56  ;;  %v229_v7 = vadd.f32 %v226_v3, %v225_v63  ;;  %v258_v63 = vrot.slane %v249_v61, %v2330_v48 }
 0x12c   :  { %v222_v8 = vadd.f32 %v221_v6, %v2352_v5  ;;  %v230_v9 = vadd.f32 %v229_v7, %v227_v2  ;;  %v262_v2 = vrot.slane %v249_v61, %v2325_v46  ;;  %v2014_v61 = vld [vmem:[#allocation7 + $0x2ec] ss:$16 sps:$4 sm:$0xff]  }
 0x12e   :  { %223 = vadd.xlane.f32.xlu0 %v222_v8  ;;  %v231_v11 = vadd.f32 %v230_v9, %v228_v10  ;;  %v284_v9 = vrot.slane %v275_v62, %v2330_v48  ;;  %v280_v10 = vrot.slane %v275_v62, %v2323_v45 }
 0x132   :  { %232 = vadd.xlane.f32.xlu0 %v231_v11  ;;  %v292_v11 = vrot.slane %v275_v62, %v2335_v52  ;;  %v2009_v62 = vld [vmem:[#allocation7 + $0x2e0] ss:$16 sps:$4 sm:$0xff]  }
 0x1bb   :  { %v224_v49 = vpop.xlane.xlu0 %223 }
 0x1bc   :  { %v234_v50 = vmul.f32 0.001953125, %v224_v49  ;;  %v2002_v49 = vld [vmem:[#allocation7 + $0x2ac] ss:$16 sps:$4 sm:$0xff]  }
 0x1be   :  { %v236_v53 = vmul.f32 %v234_v50, %v234_v50  ;;  %v239_v3 = vsub.f32 %v2337_v55, %v234_v50  ;;  %v241_v4 = vsub.f32 %v2339_v56, %v234_v50  ;;  %v240_v6 = vsub.f32 %v2341_v59, %v234_v50 }
 0x1bf   :  { %v233_v51 = vpop.xlane.xlu0 %232  ;;  %v242_v7 = vsub.f32 %v2352_v5, %v234_v50  ;;  %v1997_v50 = vld [vmem:[#allocation7 + $0x2a0] ss:$16 sps:$4 sm:$0xff]  }
 0x1c0   :  { %v235_v54 = vmul.f32 0.001953125, %v233_v51  ;;  %v2000_v51 = vld [vmem:[#allocation7 + $0x2a8] ss:$16 sps:$4 sm:$0xff]  }
 0x1c2   :  { %v237_v57 = vsub.f32 %v235_v54, %v236_v53  ;;  %v2005_v53 = vld [vmem:[#allocation7 + $0x2c4] ss:$16 sps:$4 sm:$0xff]   ;;  %v2008_v54 = vld [vmem:[#allocation7 + $0x2cc] ss:$16 sps:$4 sm:$0xff]  }
 0x1c4   :  { %v238_v58 = vmax.f32 %v237_v57, 0.0  ;;  %v2003_v57 = vld [vmem:[#allocation7 + $0x2c0] ss:$16 sps:$4 sm:$0xff]  }
 0x1c6   :  { %v243_v60 = vadd.f32 1e-05, %v238_v58  ;;  %v2006_v58 = vld [vmem:[#allocation7 + $0x2c8] ss:$16 sps:$4 sm:$0xff]  }
 0x1c8   :  { %2095 = vrsqrt.f32 %v243_v60  ;;  %v2011_v60 = vld [vmem:[#allocation7 + $0x2e4] ss:$16 sps:$4 sm:$0xff]  }
 0x1d2   :  { %v2096_v8 = vpop.eup %2095 }
 0x1d3   :  { %v246_v13 = vmul.f32 %v2096_v8, %v240_v6  ;;  %v245_v14 = vmul.f32 %v2096_v8, %v239_v3  ;;  %v248_v15 = vmul.f32 %v2096_v8, %v242_v7  ;;  %v247_v16 = vmul.f32 %v2096_v8, %v241_v4  ;;  %v2018_v3 = vld [vmem:[#allocation7 + $0x308] ss:$16 sps:$4 sm:$0xff]   ;;  %v2023_v4 = vld [vmem:[#allocation7 + $0x324] ss:$16 sps:$4 sm:$0xff]   ;;  %v2026_v6 = vld [vmem:[#allocation7 + $0x32c] ss:$16 sps:$4 sm:$0xff]  }
 0x1d4   :  { %v2021_v7 = vld [vmem:[#allocation7 + $0x320] ss:$16 sps:$4 sm:$0xff]   ;;  %v2024_v8 = vld [vmem:[#allocation7 + $0x328] ss:$16 sps:$4 sm:$0xff]  }
 0x1d5   :  { %v272_v55 = vmul.f32 %v258_v63, %v246_v13  ;;  %v271_v17 = vmul.f32 %v254_v0, %v245_v14  ;;  %v274_v56 = vmul.f32 %v266_v1, %v248_v15  ;;  %v273_v18 = vmul.f32 %v262_v2, %v247_v16  ;;  %v2012_v63 = vld [vmem:[#allocation7 + $0x2e8] ss:$16 sps:$4 sm:$0xff]   ;;  %v2017_v0 = vld [vmem:[#allocation7 + $0x304] ss:$16 sps:$4 sm:$0xff]   ;;  %v2020_v1 = vld [vmem:[#allocation7 + $0x30c] ss:$16 sps:$4 sm:$0xff]  }
 0x1d6   :  { %v2015_v2 = vld [vmem:[#allocation7 + $0x300] ss:$16 sps:$4 sm:$0xff]   ;;  %v2035_v13 = vld [vmem:[#allocation7 + $0x364] ss:$16 sps:$4 sm:$0xff]   ;;  %v2038_v14 = vld [vmem:[#allocation7 + $0x36c] ss:$16 sps:$4 sm:$0xff]  }
 0x1d7   :  { %v298_v59 = vadd.f32 %v284_v9, %v272_v55  ;;  %v297_v19 = vadd.f32 %v280_v10, %v271_v17  ;;  %v300_v5 = vadd.f32 %v292_v11, %v274_v56  ;;  %v2376_v20 = vadd.f32 %v288_v12, %v273_v18  ;;  %v2029_v9 = vld [vmem:[#allocation7 + $0x344] ss:$16 sps:$4 sm:$0xff]   ;;  %v2032_v10 = vld [vmem:[#allocation7 + $0x34c] ss:$16 sps:$4 sm:$0xff]   ;;  %v2027_v11 = vld [vmem:[#allocation7 + $0x340] ss:$16 sps:$4 sm:$0xff]  }
 0x1d8   :  { %v2030_v12 = vld [vmem:[#allocation7 + $0x348] ss:$16 sps:$4 sm:$0xff]   ;;  %v2033_v15 = vld [vmem:[#allocation7 + $0x360] ss:$16 sps:$4 sm:$0xff]   ;;  %v2041_v55 = vld [vmem:[#allocation7 + $0x384] ss:$16 sps:$4 sm:$0xff]  }
 0x1d9   :  { %v302_v21 = vmax.f32 %v298_v59, 0.0  ;;  %v301_v22 = vmax.f32 %v297_v19, 0.0  ;;  %v304_v23 = vmax.f32 %v300_v5, 0.0  ;;  %v2036_v16 = vld [vmem:[#allocation7 + $0x368] ss:$16 sps:$4 sm:$0xff]  }
 0x1da   :  { %v2044_v17 = vld [vmem:[#allocation7 + $0x38c] ss:$16 sps:$4 sm:$0xff]   ;;  %v2039_v56 = vld [vmem:[#allocation7 + $0x380] ss:$16 sps:$4 sm:$0xff]   ;;  %v2042_v18 = vld [vmem:[#allocation7 + $0x388] ss:$16 sps:$4 sm:$0xff]  }
 0x1db   :  { %v306_v24 = vpack.c.bf16 %v302_v21, %v302_v21  ;;  %v305_v27 = vpack.c.bf16 %v301_v22, %v301_v22  ;;  %v308_v30 = vpack.c.bf16 %v304_v23, %v304_v23  ;;  %v2047_v59 = vld [vmem:[#allocation7 + $0x3a4] ss:$16 sps:$4 sm:$0xff]   ;;  %v2050_v19 = vld [vmem:[#allocation7 + $0x3ac] ss:$16 sps:$4 sm:$0xff]   ;;  %v2045_v5 = vld [vmem:[#allocation7 + $0x3a0] ss:$16 sps:$4 sm:$0xff]  }
 0x1dc   :  { %v2048_v21 = vld [vmem:[#allocation7 + $0x3a8] ss:$16 sps:$4 sm:$0xff]   ;;  %v2053_v22 = vld [vmem:[#allocation7 + $0x3c4] ss:$16 sps:$4 sm:$0xff]   ;;  %v2056_v23 = vld [vmem:[#allocation7 + $0x3cc] ss:$16 sps:$4 sm:$0xff]  }
 0x1dd   :  { %1131 = vmatprep.mubr.bf16.mxu0 %v306_v24  ;;  %1213 = vmatprep.mubr.bf16.mxu1 %v306_v24  ;;  %v2051_v24 = vld [vmem:[#allocation7 + $0x3c0] ss:$16 sps:$4 sm:$0xff]  }
 0x1de   :  { %1132 = vmatmul.mubr.bf16.vlgmr.msra.gmra.mrb[4].mxu0 %v305_v27  ;;  %1214 = vmatmul.mubr.bf16.vlgmr.msra.gmra.mrb[4].mxu1 %v305_v27  ;;  %v2062_v27 = vld [vmem:[#allocation7 + $0x3ec] ss:$16 sps:$4 sm:$0xff]  }
 0x1df   :  { %1141 = vmatpush1.bf16.msra.mxu0 %v1967_v25  ;;  %1223 = vmatpush1.bf16.msra.mxu1 %v1970_v26  ;;  %v2054_v25 = vld [vmem:[#allocation7 + $0x3c8] ss:$16 sps:$4 sm:$0xff]   ;;  %v2059_v26 = vld [vmem:[#allocation7 + $0x3e4] ss:$16 sps:$4 sm:$0xff]  }
 0x1e0   :  { %1172 = vmatprep.mubr.bf16.mxu0 %v308_v30  ;;  %1254 = vmatprep.mubr.bf16.mxu1 %v308_v30  ;;  %v303_v30 = vmax.f32 %v2376_v20, 0.0  ;;  %v2071_v20 = vld [vmem:[#allocation8 + $0x50] sm:$0xff]  }
 0x1e1   :  { %1142 = vmatprep.subr.bf16.mxu0 %v1975_v28  ;;  %1224 = vmatprep.subr.bf16.mxu1 %v1978_v29  ;;  %v2057_v28 = vld [vmem:[#allocation7 + $0x3e0] ss:$16 sps:$4 sm:$0xff]   ;;  %v2060_v29 = vld [vmem:[#allocation7 + $0x3e8] ss:$16 sps:$4 sm:$0xff]  }
 0x1e3   :  { %1143 = vmatpush1.bf16.msra.mxu0 %v1973_v31  ;;  %1225 = vmatpush1.bf16.msra.mxu1 %v1976_v32  ;;  %v2063_v31 = vld [vmem:[#allocation8 + $0x40] sm:$0xff]  }
 0x1e4   :  { %1144 = vmatprep.subr.bf16.mxu0 %v1981_v33  ;;  %1226 = vmatprep.subr.bf16.mxu1 %v1984_v34  ;;  %v2064_v32 = vld [vmem:[#allocation8 + $0xc0] sm:$0xff]  }
 0x1e5   :  { %v2065_v33 = vld [vmem:[#allocation8] sm:$0xff]  }
 0x1e6   :  { %v2066_v34 = vld [vmem:[#allocation8 + $0x80] sm:$0xff]  }
 0x1e7   :  { %1145 = vmatpush1.bf16.msra.mxu0 %v1979_v35  ;;  %1227 = vmatpush1.bf16.msra.mxu1 %v1982_v36  ;;  %v307_v35 = vpack.c.bf16 %v303_v30, %v303_v30  ;;  %v2067_v36 = vld [vmem:[#allocation8 + $0x48] sm:$0xff]  }
 0x1e8   :  { %1146 = vmatprep.subr.bf16.mxu0 %v1987_v37  ;;  %1228 = vmatprep.subr.bf16.mxu1 %v1990_v38  ;;  %v2068_v37 = vld [vmem:[#allocation8 + $0xc8] sm:$0xff]  }
 0x1e9   :  { %v2069_v38 = vld [vmem:[#allocation8 + $0x8] sm:$0xff]  }
 0x1eb   :  { %1147 = vmatpush1.bf16.msra.mxu0 %v1985_v39  ;;  %1229 = vmatpush1.bf16.msra.mxu1 %v1988_v40  ;;  %v2070_v39 = vld [vmem:[#allocation8 + $0x88] sm:$0xff]   ;;  %v2072_v40 = vld [vmem:[#allocation8 + $0xd0] sm:$0xff]  }
 0x1ec   :  { %1148 = vmatprep.subr.bf16.mxu0 %v1993_v41  ;;  %1230 = vmatprep.subr.bf16.mxu1 %v1996_v42  ;;  %v2073_v41 = vld [vmem:[#allocation8 + $0x10] sm:$0xff]  }
 0x1ed   :  { %v2074_v42 = vld [vmem:[#allocation8 + $0x90] sm:$0xff]  }
 0x1ef   :  { %1149 = vmatpush1.bf16.msra.mxu0 %v1991_v43  ;;  %1231 = vmatpush1.bf16.msra.mxu1 %v1994_v44  ;;  %v2075_v43 = vld [vmem:[#allocation8 + $0x58] sm:$0xff]  }
 0x1f0   :  { %1150 = vmatprep.subr.bf16.mxu0 %v1999_v47  ;;  %1232 = vmatprep.subr.bf16.mxu1 %v2002_v49  ;;  %v2076_v44 = vld [vmem:[#allocation8 + $0xd8] sm:$0xff]  }
 0x1f1   :  { %v2077_v47 = vld [vmem:[#allocation8 + $0x18] sm:$0xff]  }
 0x1f2   :  { %v2078_v49 = vld [vmem:[#allocation8 + $0x98] sm:$0xff]  }
 0x1f3   :  { %1151 = vmatpush1.bf16.msra.mxu0 %v1997_v50  ;;  %1233 = vmatpush1.bf16.msra.mxu1 %v2000_v51  ;;  %v2079_v50 = vld [vmem:[#allocation8 + $0x60] sm:$0xff]  }
 0x1f4   :  { %1152 = vmatprep.subr.bf16.mxu0 %v2005_v53  ;;  %1234 = vmatprep.subr.bf16.mxu1 %v2008_v54  ;;  %v2080_v51 = vld [vmem:[#allocation8 + $0xe0] sm:$0xff]  }
 0x1f5   :  { %v2081_v53 = vld [vmem:[#allocation8 + $0x20] sm:$0xff]  }
 0x1f6   :  { %v2082_v54 = vld [vmem:[#allocation8 + $0xa0] sm:$0xff]  }
 0x1f7   :  { %1153 = vmatpush1.bf16.msra.mxu0 %v2003_v57  ;;  %1235 = vmatpush1.bf16.msra.mxu1 %v2006_v58  ;;  %v2083_v57 = vld [vmem:[#allocation8 + $0x68] sm:$0xff]  }
 0x1f8   :  { %1154 = vmatprep.subr.bf16.mxu0 %v2011_v60  ;;  %1236 = vmatprep.subr.bf16.mxu1 %v2014_v61  ;;  %v2084_v58 = vld [vmem:[#allocation8 + $0xe8] sm:$0xff]  }
 0x1f9   :  { %v2085_v60 = vld [vmem:[#allocation8 + $0x28] sm:$0xff]  }
 0x1fa   :  { %v2086_v61 = vld [vmem:[#allocation8 + $0xa8] sm:$0xff]  }
 0x1fb   :  { %1155 = vmatpush1.bf16.msra.mxu0 %v2009_v62  ;;  %1237 = vmatpush1.bf16.msra.mxu1 %v2012_v63  ;;  %v2087_v62 = vld [vmem:[#allocation8 + $0x70] sm:$0xff]  }
 0x1fc   :  { %1156 = vmatprep.subr.bf16.mxu0 %v2017_v0  ;;  %1238 = vmatprep.subr.bf16.mxu1 %v2020_v1  ;;  %v2088_v63 = vld [vmem:[#allocation8 + $0xf0] sm:$0xff]  }
 0x1fd   :  { %v2089_v0 = vld [vmem:[#allocation8 + $0x30] sm:$0xff]  }
 0x1fe   :  { %v2090_v1 = vld [vmem:[#allocation8 + $0xb0] sm:$0xff]  }
 0x1ff   :  { %1157 = vmatpush1.bf16.msra.mxu0 %v2015_v2  ;;  %1239 = vmatpush1.bf16.msra.mxu1 %v2018_v3  ;;  %v2091_v2 = vld [vmem:[#allocation8 + $0x78] sm:$0xff]  }
 0x200   :  { %1158 = vmatprep.subr.bf16.mxu0 %v2023_v4  ;;  %1240 = vmatprep.subr.bf16.mxu1 %v2026_v6  ;;  %v2092_v3 = vld [vmem:[#allocation8 + $0xf8] sm:$0xff]  }
 0x201   :  { %v2093_v4 = vld [vmem:[#allocation8 + $0x38] sm:$0xff]  }
 0x202   :  { %v2094_v6 = vld [vmem:[#allocation8 + $0xb8] sm:$0xff]  }
 0x203   :  { %1159 = vmatpush1.bf16.msra.mxu0 %v2021_v7  ;;  %1241 = vmatpush1.bf16.msra.mxu1 %v2024_v8  ;;  %v437_v7 = vld [vmem:[%s2407_s6] sm:$0xf] }
 0x204   :  { %1160 = vmatprep.subr.bf16.mxu0 %v2029_v9  ;;  %1242 = vmatprep.subr.bf16.mxu1 %v2032_v10  ;;  %v442_v8 = vrot.slane %v437_v7, %v2323_v45  ;;  %v450_v9 = vrot.slane %v437_v7, %v2325_v46  ;;  %v446_v10 = vrot.slane %v437_v7, %v2330_v48 }
 0x207   :  { %1161 = vmatpush1.bf16.msra.mxu0 %v2027_v11  ;;  %1243 = vmatpush1.bf16.msra.mxu1 %v2030_v12  ;;  %v454_v11 = vrot.slane %v437_v7, %v2335_v52 }
 0x208   :  { %1162 = vmatprep.subr.bf16.mxu0 %v2035_v13  ;;  %1244 = vmatprep.subr.bf16.mxu1 %v2038_v14 }
 0x20b   :  { %1163 = vmatpush1.bf16.msra.mxu0 %v2033_v15  ;;  %1245 = vmatpush1.bf16.msra.mxu1 %v2036_v16 }
 0x20c   :  { %1164 = vmatprep.subr.bf16.mxu0 %v2041_v55  ;;  %1246 = vmatprep.subr.bf16.mxu1 %v2044_v17 }
 0x20f   :  { %1165 = vmatpush1.bf16.msra.mxu0 %v2039_v56  ;;  %1247 = vmatpush1.bf16.msra.mxu1 %v2042_v18 }
 0x210   :  { %1166 = vmatprep.subr.bf16.mxu0 %v2047_v59  ;;  %1248 = vmatprep.subr.bf16.mxu1 %v2050_v19 }
 0x213   :  { %1167 = vmatpush1.bf16.msra.mxu0 %v2045_v5  ;;  %1249 = vmatpush1.bf16.msra.mxu1 %v2048_v21 }
 0x214   :  { %1168 = vmatprep.subr.bf16.mxu0 %v2053_v22  ;;  %1250 = vmatprep.subr.bf16.mxu1 %v2056_v23 }
 0x217   :  { %1169 = vmatpush1.bf16.msra.mxu0 %v2051_v24  ;;  %1251 = vmatpush1.bf16.msra.mxu1 %v2054_v25 }
 0x218   :  { %1170 = vmatprep.subr.bf16.mxu0 %v2059_v26  ;;  %1252 = vmatprep.subr.bf16.mxu1 %v2062_v27  ;;  %v1768_v27 = vld [vmem:[%s2409_s8] ss:$0 sm:$0xff] }
 0x21b   :  { %1171 = vmatpush1.bf16.msra.mxu0 %v2057_v28  ;;  %1253 = vmatpush1.bf16.msra.mxu1 %v2060_v29 }
 0x21c   :  { %1801 = vmatprep.subr.bf16.mxu0 %v2063_v31  ;;  %1823 = vmatprep.subr.bf16.mxu1 %v2064_v32 }
 0x21e   :  { %1173 = vmatmul.mubr.bf16.vlgmr.msra.gmra.mrb[4].mxu0 %v307_v35  ;;  %1255 = vmatmul.mubr.bf16.vlgmr.msra.gmra.mrb[4].mxu1 %v307_v35 }
 0x21f   :  { %1802 = vmatpush3.bf16.msra.mxu0 %v2065_v33  ;;  %1824 = vmatpush3.bf16.msra.mxu1 %v2066_v34 }
 0x220   :  { %1803 = vmatprep.subr.bf16.mxu0 %v2067_v36  ;;  %1825 = vmatprep.subr.bf16.mxu1 %v2068_v37 }
 0x223   :  { %1804 = vmatpush3.bf16.msra.mxu0 %v2069_v38  ;;  %1826 = vmatpush3.bf16.msra.mxu1 %v2070_v39 }
 0x224   :  { %1805 = vmatprep.subr.bf16.mxu0 %v2071_v20  ;;  %1827 = vmatprep.subr.bf16.mxu1 %v2072_v40 }
 0x227   :  { %1806 = vmatpush3.bf16.msra.mxu0 %v2073_v41  ;;  %1828 = vmatpush3.bf16.msra.mxu1 %v2074_v42 }
 0x228   :  { %1807 = vmatprep.subr.bf16.mxu0 %v2075_v43  ;;  %1829 = vmatprep.subr.bf16.mxu1 %v2076_v44 }
 0x22b   :  { %1808 = vmatpush3.bf16.msra.mxu0 %v2077_v47  ;;  %1830 = vmatpush3.bf16.msra.mxu1 %v2078_v49 }
 0x22c   :  { %1809 = vmatprep.subr.bf16.mxu0 %v2079_v50  ;;  %1831 = vmatprep.subr.bf16.mxu1 %v2080_v51 }
 0x22f   :  { %1810 = vmatpush3.bf16.msra.mxu0 %v2081_v53  ;;  %1832 = vmatpush3.bf16.msra.mxu1 %v2082_v54 }
 0x230   :  { %1811 = vmatprep.subr.bf16.mxu0 %v2083_v57  ;;  %1833 = vmatprep.subr.bf16.mxu1 %v2084_v58 }
 0x233   :  { %1812 = vmatpush3.bf16.msra.mxu0 %v2085_v60  ;;  %1834 = vmatpush3.bf16.msra.mxu1 %v2086_v61 }
 0x234   :  { %1813 = vmatprep.subr.bf16.mxu0 %v2087_v62  ;;  %1835 = vmatprep.subr.bf16.mxu1 %v2088_v63 }
 0x237   :  { %1814 = vmatpush3.bf16.msra.mxu0 %v2089_v0  ;;  %1836 = vmatpush3.bf16.msra.mxu1 %v2090_v1 }
 0x238   :  { %1815 = vmatprep.subr.bf16.mxu0 %v2091_v2  ;;  %1837 = vmatprep.subr.bf16.mxu1 %v2092_v3 }
 0x23b   :  { %1816 = vmatpush3.bf16.msra.mxu0 %v2093_v4  ;;  %1838 = vmatpush3.bf16.msra.mxu1 %v2094_v6 }
 0x2f1   :  { %v1174_v12 = vpop.f32.mrb[4].mxu0  ;;  %v1256_v13 = vpop.f32.mrb[4].mxu1 }
 0x2f2   :  { %v1845_v14 = vadd.f32 %v1174_v12, %v442_v8  ;;  %v1847_v15 = vadd.f32 %v1256_v13, %v450_v9  ;;  %v1176_v16 = vpop.f32.mrb[5].mxu0  ;;  %v1258_v55 = vpop.f32.mrb[5].mxu1 }
 0x2f3   :  { %v1846_v17 = vadd.f32 %v1176_v16, %v446_v10  ;;  %v1848_v56 = vadd.f32 %v1258_v55, %v454_v11  ;;  %v1178_v18 = vpop.f32.mrb[6].mxu0  ;;  %v1260_v59 = vpop.f32.mrb[6].mxu1 }
 0x2f4   :  { %v1263_v19 = vmax.f32 %v1845_v14, 0.0  ;;  %v1265_v5 = vmax.f32 %v1847_v15, 0.0  ;;  %v1179_v21 = vpop.f32.mrb[7].mxu0  ;;  %v1261_v45 = vpop.f32.mrb[7].mxu1 }
 0x2f5   :  { %v1264_v22 = vmax.f32 %v1846_v17, 0.0  ;;  %v1266_v46 = vmax.f32 %v1848_v56, 0.0 }
 0x2f6   :  { %v1267_v24 = vpack.c.bf16 %v1263_v19, %v1263_v19  ;;  %v1269_v52 = vpack.c.bf16 %v1265_v5, %v1265_v5 }
 0x2f7   :  { %v1268_v23 = vpack.c.bf16 %v1264_v22, %v1264_v22  ;;  %v1270_v48 = vpack.c.bf16 %v1266_v46, %v1266_v46 }
 0x2f9   :  { %1566 = vmatprep.mubr.bf16.mxu0 %v1268_v23  ;;  %1606 = vmatprep.mubr.bf16.mxu1 %v1270_v48 }
 0x2fa   :  { %1567 = vmatmul.mubr.bf16.vlgmr.msra.gmra.mrb[8].mxu0 %v1267_v24  ;;  %1607 = vmatmul.mubr.bf16.vlgmr.msra.gmra.mrb[8].mxu1 %v1269_v52 }
 0x3cd   :  { %v1817_v25 = vpop.f32.mrb[8].mxu0  ;;  %v1839_v26 = vpop.f32.mrb[8].mxu1 }
 0x3ce   :  { %v1818_v28 = vpop.f32.mrb[9].mxu0  ;;  %v1840_v29 = vpop.f32.mrb[9].mxu1 }
 0x3cf   :  { %v1819_v30 = vadd.f32 %v1818_v28, %v1817_v25  ;;  %v1841_v31 = vadd.f32 %v1840_v29, %v1839_v26  ;;  %v1820_v32 = vpop.f32.mrb[10].mxu0  ;;  %v1842_v33 = vpop.f32.mrb[10].mxu1 }
 0x3d0   :  { %v1821_v34 = vpop.f32.mrb[11].mxu0  ;;  %v1843_v35 = vpop.f32.mrb[11].mxu1 }
 0x3d1   :  { %v1569_v36 = vadd.f32 %v1819_v30, %v1768_v27 }
 0x3d3   :  { %v1609_v37 = vadd.f32 %v1841_v31, %v1569_v36 }
 0x3d5   :  { %1614 = vst [vmem:[#allocation10] sm:$0xff] %v1609_v37 }
 0x3d6   :  { %2196 = shalt.err (!%p2193_p8)
}
 0x3d7   :  { %s2197_s23 = scalar_lea.hbm %s2410_s9, 128 }
 0x3d8   :  { %p2198_p9 = scmp.ne.s32.totalorder %s2410_s9, %s2197_s23  ;;  %p2201_p10 = scmp.lt.u32.totalorder %s2197_s23, %s2410_s9 }
 0x3da   :  { %p2203_p11 = pnand %p2201_p10, %p2198_p9 }
 0x3dc   :  { %2206 = shalt.err (!%p2203_p11)
}
 0x3dd   :  { %1624 = dma.vmem_to_hbm [thread:$0]  %s1622_s0, 128, %s2410_s9, [#allocation4]  }
 0x3de   :  { %2213 = dma.done.wait [#allocation4], 128  }
 0x3df   :  { %2214 = vsyncadd [#allocation4], 4294967168 }
 0x3e0   :  { %1628 = vsyncpa [#allocation3], 1 }
 0x3e1   :  { %1629 = vsyncpa [#allocation6], 1 }
 0x3e2   :  { %1630 = vsyncpa [#allocation9], 1 }
 0x3e3   :  { %1631 = vsyncpa [#allocation4], 1 }

</bundles_post_ra>
